<compile_context>
chip_gen: v7x
topology: tpu7x:2x2x1
jax: 0.10.0
libtpu: 0.0.40
codegen_flags: <defaults>
</compile_context>

<pallas_src>
import jax
import jax.numpy as jnp
from jax.experimental import pallas as pl
from jax.experimental.pallas import tpu as pltpu


def _gcn_kernel(adj_ref, data_ref, weight_ref, out_ref):
    # adj_ref    : (T, N*W)   adjacency with minor dims flattened (free reshape)
    # data_ref   : (W, T*D)   activations with minor dims flattened (free reshape)
    # weight_ref : (T, D, O)  raw per-timestep weights
    # out_ref    : (W, T*O)
    T, NW = adj_ref.shape
    W, _ = data_ref.shape
    _, D, O = weight_ref.shape
    N = NW // W
    f32 = jnp.float32

    # scale[w, t] = sum_n adj[t, n, w], produced directly in (W, T) orientation
    # via one NT-form MXU matmul (the attention q@k^T pattern) so no standalone
    # lane<->sublane transpose is needed in-kernel:
    #   gather_m[w, n*W + w'] = (w' == w)
    #   scale[w, t]           = sum_j gather_m[w, j] * adj_flat[t, j]
    r = jax.lax.broadcasted_iota(jnp.int32, (W, W), 0)
    c = jax.lax.broadcasted_iota(jnp.int32, (W, W), 1)
    eye_w = (r == c).astype(f32)                           # (W, W)
    gather_m = jnp.concatenate([eye_w] * N, axis=-1)       # (W, N*W)
    scale = jax.lax.dot_general(
        gather_m, adj_ref[...].astype(f32),
        dimension_numbers=(((1,), (1,)), ((), ())),        # contract both last dims
        preferred_element_type=f32)                        # (W, T)

    # T is small and static: unroll into T (W,D)@(D,O) MXU dots.  The adj scale
    # is independent of d, so apply it AFTER the matmul (per review feedback).
    outs = []
    for t in range(T):
        x_t = data_ref[:, pl.ds(t * D, D)]                                 # (W, D)
        p_t = jnp.dot(x_t, weight_ref[t], preferred_element_type=f32)      # (W, O)
        outs.append(p_t * scale[:, t:t + 1])                               # row scale
    # Single full-ref store of the lane-contiguous output slab.
    out_ref[...] = jnp.concatenate(outs, axis=-1).astype(out_ref.dtype)    # (W, T*O)


@jax.jit
def gcn_layer(adj, data, weight):
    """adj: (T, N, W), data: (W, T, D), weight: (T, D, O) -> (W, T, O)."""
    T, N, W = adj.shape
    Wd, Td, D = data.shape
    Tw, Dw, O = weight.shape
    assert Td == T and Tw == T and Wd == W and Dw == D

    out_dtype = data.dtype

    # Free contiguous reshapes only (minor-dim merges) -- no HBM transposes,
    # no extra XLA compute fusions in the wrapper.
    adj_flat = adj.reshape(T, N * W)     # (T, N*W)
    data_flat = data.reshape(W, T * D)   # (W, T*D)

    out_flat = pl.pallas_call(
        _gcn_kernel,
        out_shape=jax.ShapeDtypeStruct((W, T * O), out_dtype),
        in_specs=[pl.BlockSpec(memory_space=pltpu.MemorySpace.VMEM)] * 3,
        out_specs=pl.BlockSpec(memory_space=pltpu.MemorySpace.VMEM),
        cost_estimate=pl.CostEstimate(
            flops=2 * W * T * D * O + 2 * W * (N * W) * T,   # true work (+ tiny adj-sum dot)
            transcendentals=0,
            bytes_accessed=4 * (adj.size + data.size + weight.size + W * T * O),
        ),
    )(adj_flat, data_flat, weight)

    # Free contiguous reshape back to the PyTorch output layout.
    return out_flat.reshape(W, T, O)
    # Note: if BDSTGNN calls this layer many times, batch those calls into one
    # pallas_call (batch on the M/row dim) and, on v7x, expose a parallel grid
    # axis over that batch for the second TensorCore.


if __name__ == "__main__":
    # Small shapes consistent with the module: T=5 (fixed by weight), N nodes,
    # W "windows", D=in_dim_gcn, O=out_dim_gcn.
    T, N, W = 5, 8, 16
    in_dim_gcn, out_dim_gcn = 32, 16

    key = jax.random.PRNGKey(0)
    k_adj, k_data, k_w = jax.random.split(key, 3)

    adj = jax.random.normal(k_adj, (T, N, W), dtype=jnp.float32)
    data = jax.random.normal(k_data, (W, T, in_dim_gcn), dtype=jnp.float32)
    # deterministic parameter init (torch.randn(5, in_dim, out_dim) equivalent)
    weight = jax.random.normal(k_w, (T, in_dim_gcn, out_dim_gcn), dtype=jnp.float32)

    out = gcn_layer(adj, data, weight)
    out = jax.block_until_ready(out)

    # reference (pure JAX einsum, mirrors the PyTorch forward)
    support_ref = jnp.einsum('tnw,wtd->wtd', adj, data)
    out_ref = jnp.einsum('wtd,tdo->wto', support_ref, weight)

    assert out.shape == (W, T, out_dim_gcn)
    assert jnp.allclose(out, out_ref, atol=1e-4, rtol=1e-4)
    print("KERNEL_OK")
</pallas_src>

<mosaic_0001>
module attributes {stable_mosaic.version = 11 : i64} {
  func.func @_gcn_kernel(%arg0: memref<5x128xf32, #tpu.memory_space<vmem>>, %arg1: memref<16x160xf32, #tpu.memory_space<vmem>>, %arg2: memref<5x32x16xf32, #tpu.memory_space<vmem>>, %arg3: memref<16x80xf32, #tpu.memory_space<vmem>>) attributes {dimension_semantics = [], scalar_prefetch = 0 : i64, scratch_operands = 0 : i64, tpu.core_type = #tpu.core_type<tc>} {
    %0 = tpu.iota {dimensions = array<i32: 0>} : vector<16x16xi32>
    %1 = tpu.iota {dimensions = array<i32: 1>} : vector<16x16xi32>
    %2 = arith.cmpi eq, %0, %1 : vector<16x16xi32>
    %3 = arith.extui %2 : vector<16x16xi1> to vector<16x16xi32>
    %4 = arith.sitofp %3 : vector<16x16xi32> to vector<16x16xf32>
    %5 = tpu.concatenate %4, %4, %4, %4, %4, %4, %4, %4 in 1 : vector<16x16xf32>, vector<16x16xf32>, vector<16x16xf32>, vector<16x16xf32>, vector<16x16xf32>, vector<16x16xf32>, vector<16x16xf32>, vector<16x16xf32> -> vector<16x128xf32>
    %c0 = arith.constant 0 : index
    %c0_0 = arith.constant 0 : index
    %6 = vector.load %arg0[%c0, %c0_0] : memref<5x128xf32, #tpu.memory_space<vmem>>, vector<5x128xf32>
    %cst = arith.constant dense<0.000000e+00> : vector<16x5xf32>
    %7 = tpu.matmul %5, %6, %cst {dimension_numbers = #tpu.dot_dimension_numbers<[1], [1], [0], [0], [0, 0, 1, 0], [], []>} : vector<16x128xf32>, vector<5x128xf32>, vector<16x5xf32> -> vector<16x5xf32>
    %c0_1 = arith.constant 0 : index
    %c0_2 = arith.constant 0 : index
    %8 = vector.load %arg1[%c0_1, %c0_2] : memref<16x160xf32, #tpu.memory_space<vmem>>, vector<16x32xf32>
    %c0_3 = arith.constant 0 : index
    %c0_4 = arith.constant 0 : index
    %c0_5 = arith.constant 0 : index
    %9 = vector.load %arg2[%c0_3, %c0_4, %c0_5] : memref<5x32x16xf32, #tpu.memory_space<vmem>>, vector<1x32x16xf32>
    %10 = vector.shape_cast %9 : vector<1x32x16xf32> to vector<32x16xf32>
    %cst_6 = arith.constant dense<0.000000e+00> : vector<16x16xf32>
    %11 = tpu.matmul %8, %10, %cst_6 {dimension_numbers = #tpu.dot_dimension_numbers<[1], [0], [0], [1], [0, 0, 1, 1], [], []>} : vector<16x32xf32>, vector<32x16xf32>, vector<16x16xf32> -> vector<16x16xf32>
    %12 = vector.extract_strided_slice %7 {offsets = [0, 0], sizes = [16, 1], strides = [1, 1]} : vector<16x5xf32> to vector<16x1xf32>
    %13 = vector.broadcast %12 : vector<16x1xf32> to vector<16x16xf32>
    %14 = arith.mulf %11, %13 : vector<16x16xf32>
    %c0_7 = arith.constant 0 : index
    %c32 = arith.constant 32 : index
    %15 = vector.load %arg1[%c0_7, %c32] : memref<16x160xf32, #tpu.memory_space<vmem>>, vector<16x32xf32>
    %c1 = arith.constant 1 : index
    %c0_8 = arith.constant 0 : index
    %c0_9 = arith.constant 0 : index
    %16 = vector.load %arg2[%c1, %c0_8, %c0_9] : memref<5x32x16xf32, #tpu.memory_space<vmem>>, vector<1x32x16xf32>
    %17 = vector.shape_cast %16 : vector<1x32x16xf32> to vector<32x16xf32>
    %cst_10 = arith.constant dense<0.000000e+00> : vector<16x16xf32>
    %18 = tpu.matmul %15, %17, %cst_10 {dimension_numbers = #tpu.dot_dimension_numbers<[1], [0], [0], [1], [0, 0, 1, 1], [], []>} : vector<16x32xf32>, vector<32x16xf32>, vector<16x16xf32> -> vector<16x16xf32>
    %19 = vector.extract_strided_slice %7 {offsets = [0, 1], sizes = [16, 1], strides = [1, 1]} : vector<16x5xf32> to vector<16x1xf32>
    %20 = vector.broadcast %19 : vector<16x1xf32> to vector<16x16xf32>
    %21 = arith.mulf %18, %20 : vector<16x16xf32>
    %c0_11 = arith.constant 0 : index
    %c64 = arith.constant 64 : index
    %22 = vector.load %arg1[%c0_11, %c64] : memref<16x160xf32, #tpu.memory_space<vmem>>, vector<16x32xf32>
    %c2 = arith.constant 2 : index
    %c0_12 = arith.constant 0 : index
    %c0_13 = arith.constant 0 : index
    %23 = vector.load %arg2[%c2, %c0_12, %c0_13] : memref<5x32x16xf32, #tpu.memory_space<vmem>>, vector<1x32x16xf32>
    %24 = vector.shape_cast %23 : vector<1x32x16xf32> to vector<32x16xf32>
    %cst_14 = arith.constant dense<0.000000e+00> : vector<16x16xf32>
    %25 = tpu.matmul %22, %24, %cst_14 {dimension_numbers = #tpu.dot_dimension_numbers<[1], [0], [0], [1], [0, 0, 1, 1], [], []>} : vector<16x32xf32>, vector<32x16xf32>, vector<16x16xf32> -> vector<16x16xf32>
    %26 = vector.extract_strided_slice %7 {offsets = [0, 2], sizes = [16, 1], strides = [1, 1]} : vector<16x5xf32> to vector<16x1xf32>
    %27 = vector.broadcast %26 : vector<16x1xf32> to vector<16x16xf32>
    %28 = arith.mulf %25, %27 : vector<16x16xf32>
    %c0_15 = arith.constant 0 : index
    %c96 = arith.constant 96 : index
    %29 = vector.load %arg1[%c0_15, %c96] : memref<16x160xf32, #tpu.memory_space<vmem>>, vector<16x32xf32>
    %c3 = arith.constant 3 : index
    %c0_16 = arith.constant 0 : index
    %c0_17 = arith.constant 0 : index
    %30 = vector.load %arg2[%c3, %c0_16, %c0_17] : memref<5x32x16xf32, #tpu.memory_space<vmem>>, vector<1x32x16xf32>
    %31 = vector.shape_cast %30 : vector<1x32x16xf32> to vector<32x16xf32>
    %cst_18 = arith.constant dense<0.000000e+00> : vector<16x16xf32>
    %32 = tpu.matmul %29, %31, %cst_18 {dimension_numbers = #tpu.dot_dimension_numbers<[1], [0], [0], [1], [0, 0, 1, 1], [], []>} : vector<16x32xf32>, vector<32x16xf32>, vector<16x16xf32> -> vector<16x16xf32>
    %33 = vector.extract_strided_slice %7 {offsets = [0, 3], sizes = [16, 1], strides = [1, 1]} : vector<16x5xf32> to vector<16x1xf32>
    %34 = vector.broadcast %33 : vector<16x1xf32> to vector<16x16xf32>
    %35 = arith.mulf %32, %34 : vector<16x16xf32>
    %c0_19 = arith.constant 0 : index
    %c128 = arith.constant 128 : index
    %36 = vector.load %arg1[%c0_19, %c128] : memref<16x160xf32, #tpu.memory_space<vmem>>, vector<16x32xf32>
    %c4 = arith.constant 4 : index
    %c0_20 = arith.constant 0 : index
    %c0_21 = arith.constant 0 : index
    %37 = vector.load %arg2[%c4, %c0_20, %c0_21] : memref<5x32x16xf32, #tpu.memory_space<vmem>>, vector<1x32x16xf32>
    %38 = vector.shape_cast %37 : vector<1x32x16xf32> to vector<32x16xf32>
    %cst_22 = arith.constant dense<0.000000e+00> : vector<16x16xf32>
    %39 = tpu.matmul %36, %38, %cst_22 {dimension_numbers = #tpu.dot_dimension_numbers<[1], [0], [0], [1], [0, 0, 1, 1], [], []>} : vector<16x32xf32>, vector<32x16xf32>, vector<16x16xf32> -> vector<16x16xf32>
    %40 = vector.extract_strided_slice %7 {offsets = [0, 4], sizes = [16, 1], strides = [1, 1]} : vector<16x5xf32> to vector<16x1xf32>
    %41 = vector.broadcast %40 : vector<16x1xf32> to vector<16x16xf32>
    %42 = arith.mulf %39, %41 : vector<16x16xf32>
    %43 = tpu.concatenate %14, %21, %28, %35, %42 in 1 : vector<16x16xf32>, vector<16x16xf32>, vector<16x16xf32>, vector<16x16xf32>, vector<16x16xf32> -> vector<16x80xf32>
    %c0_23 = arith.constant 0 : index
    %c0_24 = arith.constant 0 : index
    %44 = vector.load %arg3[%c0_23, %c0_24] : memref<16x80xf32, #tpu.memory_space<vmem>>, vector<16x80xf32>
    tpu.vector_store %arg3[%c0_23, %c0_24], %43 {strides = array<i32>} : memref<16x80xf32, #tpu.memory_space<vmem>>, vector<16x80xf32>,
    return
  }
}

</mosaic_0001>

<bundles_post_ra>
// kernel: gcn_layer.1
= control target key start
LH: loop header
LB: loop body
LE: loop exit
PB: predicated region body
PF: predicated region fallthrough
CT: control target
= control target key end

     0   :  { %v14_v0 = vlaneseq  ;;  %v921_v4 = vmov 0.0   ;;  %s922_s14 = smov 16   ;;  %s923_s15 = smov 48   ;;  %vm72_vm2 = vcmask 261120   ;;  %v929_v29 = vmov 2   ;;  %s1104_s0 = inlined_call_operand.vmem [shape: f32[5,128], index: 0, kind: input, shape index: {}]   ;;  %s1105_s1 = inlined_call_operand.vmem [shape: f32[16,160], index: 1, kind: input, shape index: {}]   ;;  %s1106_s2 = inlined_call_operand.vmem [shape: f32[5,32,16], index: 2, kind: input, shape index: {}]   ;;  %s1107_s3 = inlined_call_operand.vmem [shape: f32[16,80], index: 3, kind: output, shape index: {}]  }
   0x1   :  { %v90_v8 = vld [vmem:[%s1104_s0] sm:$0x1f]  ;;  %s924_s16 = smov 32   ;;  %s925_s17 = smov 64   ;;  %v169_v11 = vld [vmem:[%s1106_s2 + $0x8] sm:$0xff]  ;;  %v170_v12 = vld [vmem:[%s1106_s2 + $0x10] sm:$0xff]  ;;  %913 = vset.pattern.permute.xlu1 %v929_v29 }
   0x2   :  { %v15_v1 = vshrl.u32 %v14_v0, 7  ;;  %v18_v2 = vand.u32 127, %v14_v0  ;;  %764 = vmatprep.subr.mxu0 %v90_v8  ;;  %v166_v9 = vld [vmem:[%s1105_s1] sm:$0xff]  ;;  %v171_v14 = vld [vmem:[%s1106_s2 + $0x18] sm:$0xff]  ;;  %v708_v16 = vld [vmem:[%s1106_s2 + $0x28] sm:$0xff]  ;;  %s926_s4 = smov 80  }
   0x3   :  { %765 = vmatpush3.xpose.msra.mxu0 %v90_v8  ;;  %v168_v10 = vld [vmem:[%s1106_s2] sm:$0xff]  ;;  %777 = vmatprep.mubr.msk.f32.mxu1 %vm72_vm2, %v166_v9  ;;  %v828_v17 = vpack.c.bf16 %v171_v14, %v170_v12  ;;  %s927_s5 = smov 96   ;;  %v714_v20 = vld [vmem:[%s1106_s2 + $0x48] sm:$0xff]  ;;  %s928_s10 = smov 112   ;;  %v715_v22 = vld [vmem:[%s1106_s2 + $0x50] sm:$0xff]  ;;  %v930_v30 = vmov 1  }
   0x4   :  { %v16_v3 = vadd.s32 8, %v15_v1  ;;  %vm19_vm0 = vcmp.eq.s32.totalorder %v15_v1, %v18_v2  ;;  %v824_v13 = vpack.c.bf16 %v169_v11, %v168_v10  ;;  %v707_v15 = vld [vmem:[%s1106_s2 + $0x20] sm:$0xff]  ;;  %v716_v23 = vld [vmem:[%s1106_s2 + $0x58] sm:$0xff]  ;;  %v167_v24 = vld [vmem:[%s1105_s1 + $0x10] sm:$0xff]  ;;  %912 = vset.pattern.permute.xlu0 %v930_v30  ;;  %vm69_vm3 = vcmask 130048  }
   0x5   :  { %v954_v5 = vsel %vm19_vm0, 1.0, %v921_v4  ;;  %v989_v18 = vpack.c.bf16 %v708_v16, %v707_v15  ;;  %v713_v19 = vld [vmem:[%s1106_s2 + $0x40] sm:$0xff]  ;;  %v844_v25 = vpack.c.bf16 %v716_v23, %v715_v22  ;;  %v726_v27 = vld [vmem:[%s1106_s2 + $0x88] sm:$0xff]  ;;  %vm75_vm4 = vcmask 392192   ;;  %v709_v60 = vld [vmem:[%s1106_s2 + $0x30] sm:$0xff] }
   0x6   :  { %vm20_vm1 = vcmp.eq.s32.totalorder %v16_v3, %v18_v2  ;;  %825 = vmatprep.subr.bf16.mxu1 %v824_v13  ;;  %v840_v21 = vpack.c.bf16 %v714_v20, %v713_v19  ;;  %v725_v26 = vld [vmem:[%s1106_s2 + $0x80] sm:$0xff]  ;;  %vm78_vm5 = vcmask 523264   ;;  %vm81_vm6 = vcmask 654336   ;;  %v710_v61 = vld [vmem:[%s1106_s2 + $0x38] sm:$0xff]  ;;  %v720_v8 = vld [vmem:[%s1106_s2 + $0x68] sm:$0xff] }
   0x7   :  { %v956_v6 = vsel %vm20_vm1, 1.0, %v921_v4  ;;  %833 = vmatprep.subr.bf16.mxu0 %v989_v18  ;;  %827 = vmatpush3.bf16.msra.mxu1 %v824_v13  ;;  %v1015_v28 = vpack.c.bf16 %v726_v27, %v725_v26  ;;  %vm84_vm7 = vcmask 785408   ;;  %vm87_vm8 = vcmask 916480   ;;  %v727_v10 = vld [vmem:[%s1106_s2 + $0x90] sm:$0xff]  ;;  %v728_v11 = vld [vmem:[%s1106_s2 + $0x98] sm:$0xff] }
   0x8   :  { %v877_v7 = vpack.i.bf16 %v956_v6, %v954_v5  ;;  %829 = vmatprep.subr.bf16.mxu1 %v828_v17  ;;  %v860_v13 = vpack.c.bf16 %v728_v11, %v727_v10  ;;  %v721_v15 = vld [vmem:[%s1106_s2 + $0x70] sm:$0xff]  ;;  %v722_v16 = vld [vmem:[%s1106_s2 + $0x78] sm:$0xff]  ;;  %v931_v27 = vmov 3  }
   0x9   :  { %v560_v20 = vld [vmem:[%s1105_s1 + $0x18] sm:$0xff] }
   0xa   :  { %878 = vrot.lane.b32.xlu0 %v877_v7, %s922_s14  ;;  %888 = vrot.lane.b32.xlu1 %v877_v7, %s923_s15 }
   0xb   :  { %831 = vmatpush3.bf16.msra.mxu1 %v828_v17  ;;  %v559_v17 = vld [vmem:[%s1105_s1 + $0x8] sm:$0xff] }
   0xc   :  { %841 = vmatprep.subr.bf16.mxu1 %v840_v21 }
   0xe   :  { %883 = vrot.lane.b32.xlu0 %v877_v7, %s924_s16  ;;  %893 = vrot.lane.b32.xlu1 %v877_v7, %s925_s17 }
   0xf   :  { %778 = vmatmul.mubr.msk.f32.vlgmr.msra.gmra.mrb[0].mxu1 %vm72_vm2, %v167_v24 }
  0x10   :  { %843 = vmatpush3.bf16.msra.mxu1 %v840_v21 }
  0x11   :  { %845 = vmatprep.subr.bf16.mxu1 %v844_v25 }
  0x12   :  { %898 = vrot.lane.b32.xlu0 %v877_v7, %s926_s4  ;;  %903 = vrot.lane.b32.xlu1 %v877_v7, %s927_s5 }
  0x14   :  { %847 = vmatpush3.bf16.msra.mxu1 %v844_v25 }
  0x15   :  { %857 = vmatprep.subr.bf16.mxu1 %v1015_v28 }
  0x16   :  { %908 = vrot.lane.b32.xlu0 %v877_v7, %s928_s10  ;;  %270 = vrot.lane.b32.xlu1 %v166_v9, %s927_s5 }
  0x1a   :  { %272 = vrot.lane.b32.xlu0 %v167_v24, %s927_s5  ;;  %368 = vrot.lane.b32.xlu1 %v166_v9, %s925_s17 }
  0x1e   :  { %370 = vrot.lane.b32.xlu0 %v167_v24, %s925_s17  ;;  %466 = vrot.lane.b32.xlu1 %v166_v9, %s924_s16 }
  0x22   :  { %468 = vrot.lane.b32.xlu0 %v167_v24, %s924_s16 }
  0x7c   :  { %v879_v31 = vpop.permute.xlu0 %878  ;;  %v889_v32 = vpop.permute.xlu1 %888 }
  0x7d   :  { %v881_v33 = vunpack.i.h.bf16 %v879_v31  ;;  %v880_v34 = vunpack.i.l.bf16 %v879_v31  ;;  %v891_v43 = vunpack.i.h.bf16 %v889_v32  ;;  %v890_v44 = vunpack.i.l.bf16 %v889_v32 }
  0x7f   :  { %v71_v41 = vsel %vm69_vm3, %v956_v6, %v881_v33  ;;  %v70_v42 = vsel %vm69_vm3, %v954_v5, %v880_v34  ;;  %v836_v5 = vpack.c.bf16 %v710_v61, %v709_v60  ;;  %v719_v6 = vld [vmem:[%s1106_s2 + $0x60] sm:$0xff]  ;;  %v932_v33 = vmov 4  }
  0x80   :  { %v884_v35 = vpop.permute.xlu0 %883  ;;  %v894_v36 = vpop.permute.xlu1 %893  ;;  %v848_v12 = vpack.c.bf16 %v720_v8, %v719_v6 }
  0x81   :  { %v886_v37 = vunpack.i.h.bf16 %v884_v35  ;;  %v885_v38 = vunpack.i.l.bf16 %v884_v35  ;;  %v896_v39 = vunpack.i.h.bf16 %v894_v36  ;;  %v895_v40 = vunpack.i.l.bf16 %v894_v36 }
  0x83   :  { %v73_v45 = vsel %vm72_vm2, %v70_v42, %v885_v38  ;;  %v74_v46 = vsel %vm72_vm2, %v71_v41, %v886_v37  ;;  %v933_v38 = vmov 0  }
  0x84   :  { %v76_v47 = vsel %vm75_vm4, %v73_v45, %v890_v44  ;;  %v77_v48 = vsel %vm75_vm4, %v74_v46, %v891_v43  ;;  %v899_v49 = vpop.permute.xlu0 %898  ;;  %v904_v50 = vpop.permute.xlu1 %903 }
  0x85   :  { %v79_v51 = vsel %vm78_vm5, %v76_v47, %v895_v40  ;;  %v80_v52 = vsel %vm78_vm5, %v77_v48, %v896_v39  ;;  %v901_v53 = vunpack.i.h.bf16 %v899_v49  ;;  %v900_v54 = vunpack.i.l.bf16 %v899_v49 }
  0x86   :  { %v906_v55 = vunpack.i.h.bf16 %v904_v50  ;;  %v905_v56 = vunpack.i.l.bf16 %v904_v50 }
  0x87   :  { %v82_v57 = vsel %vm81_vm6, %v79_v51, %v900_v54  ;;  %v83_v58 = vsel %vm81_vm6, %v80_v52, %v901_v53 }
  0x88   :  { %v909_v59 = vpop.permute.xlu0 %908  ;;  %v271_v62 = vpop.permute.xlu1 %270  ;;  %v85_v1 = vsel %vm84_vm7, %v82_v57, %v905_v56  ;;  %v86_v2 = vsel %vm84_vm7, %v83_v58, %v906_v55 }
  0x89   :  { %v911_v63 = vunpack.i.h.bf16 %v909_v59  ;;  %v910_v0 = vunpack.i.l.bf16 %v909_v59 }
  0x8b   :  { %v88_v3 = vsel %vm87_vm8, %v85_v1, %v910_v0  ;;  %v89_v4 = vsel %vm87_vm8, %v86_v2, %v911_v63 }
  0x8c   :  { %766 = vmatprep.mubr.f32.mxu0 %v88_v3  ;;  %v273_v7 = vpop.permute.xlu0 %272  ;;  %v369_v9 = vpop.permute.xlu1 %368 }
  0x8d   :  { %767 = vmatmul.mubr.f32.vlgmr.msra.gmra.mrb[0].mxu0 %v89_v4  ;;  %799 = vmatprep.mubr.msk.f32.mxu1 %vm72_vm2, %v369_v9 }
  0x8e   :  { %835 = vmatpush3.bf16.msra.mxu0 %v989_v18  ;;  %788 = vmatprep.mubr.msk.f32.mxu0 %vm72_vm2, %v271_v62  ;;  %v852_v18 = vpack.c.bf16 %v722_v16, %v721_v15 }
  0x8f   :  { %837 = vmatprep.subr.bf16.mxu0 %v836_v5 }
  0x90   :  { %v371_v14 = vpop.permute.xlu0 %370  ;;  %v467_v19 = vpop.permute.xlu1 %466 }
  0x91   :  { %800 = vmatmul.mubr.msk.f32.vlgmr.msra.gmra.mrb[2].mxu1 %vm72_vm2, %v371_v14 }
  0x92   :  { %839 = vmatpush3.bf16.msra.mxu0 %v836_v5  ;;  %859 = vmatpush3.bf16.msra.mxu1 %v1015_v28 }
  0x93   :  { %849 = vmatprep.subr.bf16.mxu0 %v848_v12  ;;  %861 = vmatprep.subr.bf16.mxu1 %v860_v13 }
  0x94   :  { %821 = vmatprep.mubr.msk.f32.mxu1 %vm72_vm2, %v559_v17  ;;  %v469_v21 = vpop.permute.xlu0 %468 }
  0x95   :  { %789 = vmatmul.mubr.msk.f32.vlgmr.msra.gmra.mrb[2].mxu0 %vm72_vm2, %v273_v7 }
  0x96   :  { %851 = vmatpush3.bf16.msra.mxu0 %v848_v12  ;;  %810 = vmatprep.mubr.msk.f32.mxu0 %vm72_vm2, %v467_v19 }
  0x97   :  { %853 = vmatprep.subr.bf16.mxu0 %v852_v18  ;;  %863 = vmatpush3.bf16.msra.mxu1 %v860_v13 }
  0x9a   :  { %855 = vmatpush3.bf16.msra.mxu0 %v852_v18  ;;  %822 = vmatmul.mubr.msk.f32.vlgmr.msra.gmra.mrb[4].mxu1 %vm72_vm2, %v560_v20 }
  0x9d   :  { %811 = vmatmul.mubr.msk.f32.vlgmr.msra.gmra.mrb[4].mxu0 %vm72_vm2, %v469_v21 }
  0xe2   :  { %v779_v22 = vpop.f32.mrb[0].mxu1 }
  0xe3   :  { %v1075_v23 = vpop.f32.mrb[1].mxu1 }
 0x160   :  { %v768_v24 = vpop.f32.mrb[0].mxu0 }
 0x161   :  { %456 = vperm.xlu1 %913, %v768_v24   ;;  %358 = vperm.xlu0 %912, %v768_v24   ;;  %v157_v25 = vpop.f32.mrb[1].mxu0 }
 0x164   :  { %v801_v26 = vpop.f32.mrb[2].mxu1 }
 0x165   :  { %914 = vset.pattern.permute.xlu1 %v931_v27  ;;  %917 = vset.pattern.permute.xlu0 %v931_v27  ;;  %v442_v28 = vpop.f32.mrb[3].mxu1 }
 0x166   :  { %554 = vperm.xlu1 %914, %v768_v24   ;;  %550 = vperm.xlu0 %917, %v157_v25  }
 0x168   :  { %v790_v31 = vpop.f32.mrb[2].mxu0 }
 0x169   :  { %v344_v32 = vpop.f32.mrb[3].mxu0 }
 0x16a   :  { %915 = vset.pattern.permute.xlu1 %v930_v30  ;;  %919 = vset.pattern.permute.xlu0 %v932_v33 }
 0x16b   :  { %652 = vperm.xlu0 %919, %v768_v24   ;;  %354 = vperm.xlu1 %915, %v157_v25  }
 0x16d   :  { %v823_v34 = vpop.f32.mrb[4].mxu1 }
 0x16e   :  { %v638_v37 = vpop.f32.mrb[5].mxu1 }
 0x16f   :  { %916 = vset.pattern.permute.xlu1 %v929_v29 }
 0x170   :  { %452 = vperm.xlu1 %916, %v157_v25   ;;  %v812_v35 = vpop.f32.mrb[4].mxu0 }
 0x171   :  { %v540_v36 = vpop.f32.mrb[5].mxu0 }
 0x174   :  { %918 = vset.pattern.permute.xlu1 %v932_v33 }
 0x175   :  { %648 = vperm.xlu1 %918, %v157_v25  }
 0x179   :  { %920 = vset.pattern.permute.xlu1 %v933_v38 }
 0x17a   :  { %260 = vperm.xlu1 %920, %v768_v24  }
 0x17e   :  { %255 = vperm.xlu1 %920, %v157_v25  }
 0x1e0   :  { %v457_v39 = vpop.permute.xlu1 %456  ;;  %v359_v40 = vpop.permute.xlu0 %358 }
 0x1e1   :  { %v362_v30 = vmul.f32 %v790_v31, %v359_v40  ;;  %v460_v41 = vmul.f32 %v801_v26, %v457_v39 }
 0x1e3   :  { %661 = vrot.lane.b32.xlu1 %v362_v30, %s922_s14 }
 0x1e5   :  { %v555_v42 = vpop.permute.xlu1 %554  ;;  %v551_v43 = vpop.permute.xlu0 %550 }
 0x1e6   :  { %v558_v29 = vmul.f32 %v812_v35, %v555_v42  ;;  %v557_v50 = vmul.f32 %v551_v43, %v540_v36 }
 0x1e7   :  { %669 = vrot.lane.b32.xlu1 %v460_v41, %s924_s16 }
 0x1ea   :  { %v653_v44 = vpop.permute.xlu0 %652  ;;  %v355_v45 = vpop.permute.xlu1 %354 }
 0x1eb   :  { %v361_v46 = vmul.f32 %v355_v45, %v344_v32  ;;  %677 = vrot.lane.b32.xlu1 %v558_v29, %s923_s15  ;;  %v656_v47 = vmul.f32 %v823_v34, %v653_v44 }
 0x1ed   :  { %659 = vrot.lane.b32.xlu0 %v361_v46, %s922_s14 }
 0x1ef   :  { %v453_v48 = vpop.permute.xlu1 %452  ;;  %685 = vrot.lane.b32.xlu1 %v656_v47, %s925_s17 }
 0x1f0   :  { %v459_v49 = vmul.f32 %v453_v48, %v442_v28 }
 0x1f2   :  { %667 = vrot.lane.b32.xlu0 %v459_v49, %s924_s16 }
 0x1f4   :  { %v649_v51 = vpop.permute.xlu1 %648 }
 0x1f5   :  { %v655_v52 = vmul.f32 %v649_v51, %v638_v37 }
 0x1f6   :  { %675 = vrot.lane.b32.xlu0 %v557_v50, %s923_s15 }
 0x1f9   :  { %v261_v53 = vpop.permute.xlu1 %260 }
 0x1fa   :  { %683 = vrot.lane.b32.xlu0 %v655_v52, %s925_s17  ;;  %v264_v57 = vmul.f32 %v779_v22, %v261_v53 }
 0x1fd   :  { %v256_v54 = vpop.permute.xlu1 %255 }
 0x1fe   :  { %v263_v2 = vmul.f32 %v256_v54, %v1075_v23 }
 0x255   :  { %v662_v55 = vpop.permute.xlu1 %661 }
 0x256   :  { %v690_v59 = vsel %vm69_vm3, %v264_v57, %v662_v55 }
 0x259   :  { %v670_v56 = vpop.permute.xlu1 %669 }
 0x25a   :  { %v692_v61 = vsel %vm72_vm2, %v690_v59, %v670_v56 }
 0x25d   :  { %v678_v58 = vpop.permute.xlu1 %677 }
 0x25e   :  { %v694_v62 = vsel %vm75_vm4, %v692_v61, %v678_v58 }
 0x25f   :  { %v660_v60 = vpop.permute.xlu0 %659 }
 0x260   :  { %v689_v4 = vsel %vm69_vm3, %v263_v2, %v660_v60 }
 0x261   :  { %v686_v63 = vpop.permute.xlu1 %685 }
 0x262   :  { %v696_v0 = vsel %vm78_vm5, %v694_v62, %v686_v63 }
 0x263   :  { %698 = vst.msk [vmem:[%s1107_s3 + $0x8] sm:$0xff] %vm81_vm6, %v696_v0 }
 0x264   :  { %v668_v1 = vpop.permute.xlu0 %667 }
 0x265   :  { %v691_v5 = vsel %vm72_vm2, %v689_v4, %v668_v1 }
 0x268   :  { %v676_v3 = vpop.permute.xlu0 %675 }
 0x269   :  { %v693_v6 = vsel %vm75_vm4, %v691_v5, %v676_v3 }
 0x26c   :  { %v684_v7 = vpop.permute.xlu0 %683 }
 0x26d   :  { %v695_v8 = vsel %vm78_vm5, %v693_v6, %v684_v7 }
 0x26e   :  { %697 = vst.msk [vmem:[%s1107_s3] sm:$0xff] %vm81_vm6, %v695_v8 }

</bundles_post_ra>
